<compile_context>
chip_gen: v7x
topology: tpu7x:2x2x1
jax: 0.10.0
libtpu: 0.0.40
codegen_flags: <defaults>
</compile_context>

<pallas_src>
import functools

import numpy as np
import jax
import jax.numpy as jnp
from jax.experimental import pallas as pl
from jax.experimental.pallas import tpu as pltpu


def _round_up(v, k):
    return (v + k - 1) // k * k


def _smearing_kernel(x_ref, o_ref, *, scale, start, step, num_gaussians):
    # x_ref: (bn, m) f32   o_ref: (bn, m, G) out_dtype
    # Scaled offsets as a tiny (1, 1, G) compile-time constant (lanes only).
    g = jax.lax.broadcasted_iota(jnp.int32, (1, 1, num_gaussians), 2)
    offs_s = (start + g.astype(jnp.float32) * step) * scale
    # coeff folded into scale = sqrt(-coeff): applied once per input element
    # (1/G of the output work) instead of once per output element.
    xs = x_ref[...].astype(jnp.float32) * scale
    # Lane->sublane broadcast of x lands on the XLU (idle here).
    d = xs[:, :, None] - offs_s                       # (bn, m, G)
    # exp in f32 on the EUP; cast only at the store (bf16 halves HBM writes).
    o_ref[...] = jnp.exp(-(d * d)).astype(o_ref.dtype)


def _choose_block_rows(n, m, num_gaussians, out_bytes, target_block_bytes):
    """Rows of n per grid step: ~target_block_bytes of output VMEM per block,
    >= 8 grid steps when n is large (v7x megacore + pipelining), and the
    input-block sublane dim (bn) either a multiple of 8 or the full n."""
    per_row = _round_up(m, 8) * _round_up(num_gaussians, 128) * max(out_bytes, 2)
    bn = max(1, int(target_block_bytes) // per_row)
    if n >= 64:
        bn = min(bn, pl.cdiv(n, 8))
    if bn >= n:
        return n
    return min(n, max(8, (bn // 8) * 8))


def gaussian_smearing(x, start=0.0, stop=5.0, num_gaussians=64, *,
                      out_dtype=jnp.float32, block_rows=None,
                      target_block_bytes=4 << 20):
    """x: (n, m) -> (n, m, num_gaussians)  (GaussianSmearing.forward)."""
    if num_gaussians < 2:
        raise ValueError("num_gaussians must be >= 2")
    n, m = x.shape

    # f32 constants (parity with the torch f32 buffers), no device sync.
    start_f = np.float32(start)
    stop_f = np.float32(stop)
    step_f = np.float32((stop_f - start_f) / np.float32(num_gaussians - 1))
    coeff_f = np.float32(-0.5) / (step_f * step_f)
    scale_f = np.float32(np.sqrt(-coeff_f))

    out_bytes = jnp.dtype(out_dtype).itemsize
    bn = block_rows if block_rows is not None else _choose_block_rows(
        n, m, num_gaussians, out_bytes, target_block_bytes)
    bn = min(bn, n)
    grid_n = pl.cdiv(n, bn)

    kernel = functools.partial(
        _smearing_kernel,
        scale=float(scale_f),
        start=float(start_f),
        step=float(step_f),
        num_gaussians=num_gaussians,
    )

    return pl.pallas_call(
        kernel,
        out_shape=jax.ShapeDtypeStruct((n, m, num_gaussians), out_dtype),
        grid=(grid_n,),
        in_specs=[pl.BlockSpec((bn, m), lambda i: (i, 0))],
        out_specs=pl.BlockSpec((bn, m, num_gaussians), lambda i: (i, 0, 0)),
        compiler_params=pltpu.CompilerParams(
            dimension_semantics=("parallel",)),
    )(x.astype(jnp.float32))


def _reference(x, start=0.0, stop=5.0, num_gaussians=64):
    offset = jnp.linspace(start, stop, num_gaussians, dtype=jnp.float32)
    coeff = -0.5 / (offset[1] - offset[0]) ** 2
    d = x[:, :, None] - offset[None, None, :]
    return jnp.exp(coeff * d * d)


if __name__ == "__main__":
    key = jax.random.PRNGKey(0)

    # Small pairwise-distance-like input, as the module's forward implies.
    n, m = 8, 16
    x = jax.random.uniform(key, (n, m), jnp.float32, 0.0, 5.0)
    out = jax.block_until_ready(gaussian_smearing(x))
    ref = _reference(x)
    assert out.shape == (n, m, 64), out.shape
    assert jnp.allclose(out, ref, atol=1e-5, rtol=1e-5), float(
        jnp.max(jnp.abs(out - ref)))

    # Multi-step grid with a masked partial last block (forced small tile).
    x2 = jax.random.uniform(jax.random.PRNGKey(1), (20, 16), jnp.float32, 0.0, 5.0)
    out2 = jax.block_until_ready(gaussian_smearing(x2, block_rows=8))
    ref2 = _reference(x2)
    assert out2.shape == (20, 16, 64), out2.shape
    assert jnp.allclose(out2, ref2, atol=1e-5, rtol=1e-5), float(
        jnp.max(jnp.abs(out2 - ref2)))

    # Odd (non-8/128-aligned) n and m, single full block.
    x3 = jax.random.uniform(jax.random.PRNGKey(2), (13, 7), jnp.float32, 0.0, 5.0)
    out3 = jax.block_until_ready(gaussian_smearing(x3))
    ref3 = _reference(x3)
    assert out3.shape == (13, 7, 64), out3.shape
    assert jnp.allclose(out3, ref3, atol=1e-5, rtol=1e-5), float(
        jnp.max(jnp.abs(out3 - ref3)))

    # bf16 output path (halves the dominant HBM store stream; exp stays f32).
    out_bf16 = jax.block_until_ready(gaussian_smearing(x, out_dtype=jnp.bfloat16))
    assert out_bf16.shape == (n, m, 64), out_bf16.shape
    assert jnp.allclose(out_bf16.astype(jnp.float32), ref, atol=2e-2, rtol=2e-2)

    print("KERNEL_OK")
</pallas_src>

<mosaic_0001>
module attributes {stable_mosaic.version = 11 : i64} {
  func.func @_smearing_kernel(%arg0: i32, %arg1: memref<8x16xf32, #tpu.memory_space<vmem>>, %arg2: memref<8x16x64xf32, #tpu.memory_space<vmem>>) attributes {dimension_semantics = [#tpu.dimension_semantics<parallel>], iteration_bounds = array<i64: 1>, scalar_prefetch = 0 : i64, scratch_operands = 0 : i64, tpu.core_type = #tpu.core_type<tc>, window_params = [{transform_indices = @transform_0, window_bounds = array<i64: 8, 16>}, {transform_indices = @transform_1, window_bounds = array<i64: 8, 16, 64>}]} {
    %0 = tpu.iota {dimensions = array<i32: 2>} : vector<1x1x64xi32>
    %1 = arith.sitofp %0 : vector<1x1x64xi32> to vector<1x1x64xf32>
    %cst = arith.constant 0.079365082 : f32
    %2 = vector.broadcast %cst : f32 to vector<1x1x64xf32>
    %3 = arith.mulf %1, %2 : vector<1x1x64xf32>
    %cst_0 = arith.constant 0.000000e+00 : f32
    %4 = vector.broadcast %cst_0 : f32 to vector<1x1x64xf32>
    %5 = arith.addf %4, %3 : vector<1x1x64xf32>
    %cst_1 = arith.constant 8.90954494 : f32
    %6 = vector.broadcast %cst_1 : f32 to vector<1x1x64xf32>
    %7 = arith.mulf %5, %6 : vector<1x1x64xf32>
    %c0 = arith.constant 0 : index
    %c0_2 = arith.constant 0 : index
    %8 = vector.load %arg1[%c0, %c0_2] : memref<8x16xf32, #tpu.memory_space<vmem>>, vector<8x16xf32>
    %cst_3 = arith.constant 8.90954494 : f32
    %9 = vector.broadcast %cst_3 : f32 to vector<8x16xf32>
    %10 = arith.mulf %8, %9 : vector<8x16xf32>
    %11 = vector.shape_cast %10 : vector<8x16xf32> to vector<8x16x1xf32>
    %12 = vector.broadcast %11 : vector<8x16x1xf32> to vector<8x16x64xf32>
    %13 = vector.broadcast %7 : vector<1x1x64xf32> to vector<8x16x64xf32>
    %14 = arith.subf %12, %13 : vector<8x16x64xf32>
    %15 = arith.mulf %14, %14 : vector<8x16x64xf32>
    %cst_4 = arith.constant 0.000000e+00 : f32
    %16 = vector.broadcast %cst_4 : f32 to vector<8x16x64xf32>
    %17 = arith.subf %16, %15 : vector<8x16x64xf32>
    %18 = math.exp %17 : vector<8x16x64xf32>
    %c0_5 = arith.constant 0 : index
    %c0_6 = arith.constant 0 : index
    %c0_7 = arith.constant 0 : index
    %19 = vector.load %arg2[%c0_5, %c0_6, %c0_7] : memref<8x16x64xf32, #tpu.memory_space<vmem>>, vector<8x16x64xf32>
    tpu.vector_store %arg2[%c0_5, %c0_6, %c0_7], %18 {strides = array<i32>} : memref<8x16x64xf32, #tpu.memory_space<vmem>>, vector<8x16x64xf32>,
    return
  }
  func.func @transform_0(%arg0: i32) -> (i32, i32) {
    %c0_i32 = arith.constant 0 : i32
    %c0_i32_0 = arith.constant 0 : i32
    return %arg0, %c0_i32 : i32, i32
  }
  func.func @transform_1(%arg0: i32) -> (i32, i32, i32) {
    %c0_i32 = arith.constant 0 : i32
    %c0_i32_0 = arith.constant 0 : i32
    %c0_i32_1 = arith.constant 0 : i32
    return %arg0, %c0_i32, %c0_i32_0 : i32, i32, i32
  }
}

</mosaic_0001>

<bundles_post_ra>
// kernel: tpu_custom_call.1
= control target key start
LH: loop header
LB: loop body
LE: loop exit
PB: predicated region body
PF: predicated region fallthrough
CT: control target
= control target key end

     0   :  { %6 = vsyncpa [#allocation3], 0  ;;  %s387_s0 = inlined_call_operand.hbm [shape: f32[8,16], index: 0, kind: input, shape index: {}]   ;;  %s388_s1 = inlined_call_operand.hbm [shape: f32[8,16,64], index: 1, kind: output, shape index: {}]  }
   0x1   :  { %7 = vsyncpa [#allocation4], 0  ;;  %s315_s6 = smov [#allocation2]   ;;  %s267_s10 = scalar_lea.hbm %s387_s0, 128 }
   0x2   :  { %s14_s7 = sshll.u32 %s315_s6, 4  ;;  %p268_p0 = scmp.ne.s32.totalorder %s387_s0, %s267_s10  ;;  %s15_s7 = int_to_ptr.vmem [resolvable:$true] %s14_s7 }
   0x3   :  { %p271_p1 = scmp.lt.u32.totalorder %s267_s10, %s387_s0 }
   0x5   :  { %p273_p2 = pnand %p271_p1, %p268_p0 }
   0x7   :  { %276 = shalt.err (!%p273_p2)
}
   0x8   :  { %s277_s15 = scalar_lea.vmem %s15_s7, 128  ;;  %p282_p4 = scmp.lt.s32.totalorder %s15_s7, %s15_s7 }
   0x9   :  { %p278_p3 = scmp.ne.s32.totalorder %s15_s7, %s277_s15  ;;  %p283_p5 = scmp.lt.s32.totalorder %s277_s15, %s277_s15 }
   0xb   :  { %p284_p6 = por %p283_p5, %p282_p4 }
   0xd   :  { %p285_p7 = pnand %p284_p6, %p278_p3 }
   0xf   :  { %288 = shalt.err (!%p285_p7)
}
  0x10   :  { %17 = dma.hbm_to_vmem [thread:$0]  %s387_s0, 128, %s15_s7, [#allocation3]  }
  0x11   :  { %311 = dma.done.wait [#allocation3], 128  }
  0x12   :  { %312 = vsyncadd [#allocation3], 4294967168  ;;  %v21_v0 = vlaneseq  ;;  %v27_v4 = vld [vmem:[#allocation2] sm:$0xff]  ;;  %vm197_vm0 = vcmask 523264   ;;  %s316_s0 = smov [#allocation5]  }
  0x13   :  { %v28_v5 = vmul.f32 8.909545, %v27_v4  ;;  %s219_s18 = sshll.u32 %s316_s0, 4  ;;  %s220_s18 = int_to_ptr.vmem [resolvable:$true] %s219_s18 }
  0x14   :  { %v30_v1 = vshrl.u32 %v21_v0, 7  ;;  %v22_v20 = vand.u32 127, %v21_v0  ;;  %s289_s19 = scalar_lea.vmem %s220_s18, 2048  ;;  %p294_p9 = scmp.lt.s32.totalorder %s220_s18, %s220_s18 }
  0x15   :  { %p290_p8 = scmp.ne.s32.totalorder %s220_s18, %s289_s19  ;;  %p295_p10 = scmp.lt.s32.totalorder %s289_s19, %s289_s19 }
  0x16   :  { %v42_v2 = vsub.s32 1, %v30_v1  ;;  %v31_v3 = vsub.s32 0, %v30_v1  ;;  %v53_v8 = vsub.s32 2, %v30_v1  ;;  %v64_v10 = vsub.s32 3, %v30_v1 }
  0x17   :  { %v75_v12 = vsub.s32 4, %v30_v1  ;;  %v86_v14 = vsub.s32 5, %v30_v1  ;;  %v97_v16 = vsub.s32 6, %v30_v1  ;;  %v108_v18 = vsub.s32 7, %v30_v1  ;;  %p296_p11 = por %p295_p10, %p294_p9 }
  0x18   :  { %v43_v6 = vrot.slane %v28_v5, %v42_v2  ;;  %v32_v7 = vrot.slane %v28_v5, %v31_v3  ;;  %v54_v9 = vrot.slane %v28_v5, %v53_v8  ;;  %v65_v11 = vrot.slane %v28_v5, %v64_v10 }
  0x19   :  { %v76_v13 = vrot.slane %v28_v5, %v75_v12  ;;  %v87_v15 = vrot.slane %v28_v5, %v86_v14  ;;  %v98_v17 = vrot.slane %v28_v5, %v97_v16  ;;  %v109_v19 = vrot.slane %v28_v5, %v108_v18  ;;  %p297_p12 = pnand %p296_p11, %p290_p8 }
  0x1a   :  { %45 = vbcast.lane.b32.xlu1 %v43_v6, 256  ;;  %34 = vbcast.lane.b32.xlu0 %v32_v7, 256  ;;  %v23_v21 = vcvt.s32.f32 %v22_v20 }
  0x1c   :  { %v24_v22 = vmul.f32 0.07936508, %v23_v21 }
  0x1e   :  { %49 = vbcast.lane.b32.xlu1 %v43_v6, 264  ;;  %38 = vbcast.lane.b32.xlu0 %v32_v7, 264  ;;  %v341_v23 = vmul.f32 8.909545, %v24_v22 }
  0x22   :  { %60 = vbcast.lane.b32.xlu1 %v54_v9, 264  ;;  %56 = vbcast.lane.b32.xlu0 %v54_v9, 256 }
  0x26   :  { %71 = vbcast.lane.b32.xlu1 %v65_v11, 264  ;;  %67 = vbcast.lane.b32.xlu0 %v65_v11, 256 }
  0x2a   :  { %82 = vbcast.lane.b32.xlu1 %v76_v13, 264  ;;  %78 = vbcast.lane.b32.xlu0 %v76_v13, 256 }
  0x2e   :  { %93 = vbcast.lane.b32.xlu1 %v87_v15, 264  ;;  %89 = vbcast.lane.b32.xlu0 %v87_v15, 256 }
  0x32   :  { %104 = vbcast.lane.b32.xlu1 %v98_v17, 264  ;;  %100 = vbcast.lane.b32.xlu0 %v98_v17, 256 }
  0x36   :  { %115 = vbcast.lane.b32.xlu1 %v109_v19, 264  ;;  %111 = vbcast.lane.b32.xlu0 %v109_v19, 256 }
  0x8c   :  { %v46_v24 = vpop.permute.xlu1 %45  ;;  %v35_v25 = vpop.permute.xlu0 %34 }
  0x8d   :  { %v119_v26 = vsub.f32 %v46_v24, %v341_v23  ;;  %v117_v27 = vsub.f32 %v35_v25, %v341_v23 }
  0x8f   :  { %v135_v28 = vmul.f32 %v119_v26, %v119_v26  ;;  %v133_v29 = vmul.f32 %v117_v27, %v117_v27 }
  0x90   :  { %v50_v30 = vpop.permute.xlu1 %49  ;;  %v39_v31 = vpop.permute.xlu0 %38 }
  0x91   :  { %v151_v32 = vsub.f32 0.0, %v135_v28  ;;  %v149_v33 = vsub.f32 0.0, %v133_v29  ;;  %v120_v34 = vsub.f32 %v50_v30, %v341_v23  ;;  %v118_v35 = vsub.f32 %v39_v31, %v341_v23 }
  0x93   :  { %v169_v36 = vmul.f32 1.442695, %v151_v32  ;;  %v165_v37 = vmul.f32 1.442695, %v149_v33  ;;  %v136_v38 = vmul.f32 %v120_v34, %v120_v34  ;;  %v134_v39 = vmul.f32 %v118_v35, %v118_v35 }
  0x94   :  { %v61_v40 = vpop.permute.xlu1 %60  ;;  %v57_v41 = vpop.permute.xlu0 %56 }
  0x95   :  { %235 = vpow2.f32 %v169_v36  ;;  %v152_v42 = vsub.f32 0.0, %v136_v38  ;;  %v150_v43 = vsub.f32 0.0, %v134_v39  ;;  %v122_v44 = vsub.f32 %v61_v40, %v341_v23 }
  0x96   :  { %237 = vpow2.f32 %v165_v37  ;;  %v121_v45 = vsub.f32 %v57_v41, %v341_v23 }
  0x97   :  { %v171_v46 = vmul.f32 1.442695, %v152_v42  ;;  %v167_v47 = vmul.f32 1.442695, %v150_v43  ;;  %v138_v48 = vmul.f32 %v122_v44, %v122_v44 }
  0x98   :  { %v137_v49 = vmul.f32 %v121_v45, %v121_v45  ;;  %v72_v50 = vpop.permute.xlu1 %71  ;;  %v68_v51 = vpop.permute.xlu0 %67 }
  0x99   :  { %239 = vpow2.f32 %v171_v46  ;;  %v154_v52 = vsub.f32 0.0, %v138_v48  ;;  %v124_v53 = vsub.f32 %v72_v50, %v341_v23  ;;  %v123_v54 = vsub.f32 %v68_v51, %v341_v23 }
  0x9a   :  { %241 = vpow2.f32 %v167_v47  ;;  %v153_v55 = vsub.f32 0.0, %v137_v49 }
  0x9b   :  { %v175_v56 = vmul.f32 1.442695, %v154_v52  ;;  %v140_v57 = vmul.f32 %v124_v53, %v124_v53  ;;  %v139_v58 = vmul.f32 %v123_v54, %v123_v54 }
  0x9c   :  { %v173_v59 = vmul.f32 1.442695, %v153_v55  ;;  %v83_v60 = vpop.permute.xlu1 %82  ;;  %v79_v61 = vpop.permute.xlu0 %78 }
  0x9d   :  { %243 = vpow2.f32 %v175_v56  ;;  %v156_v62 = vsub.f32 0.0, %v140_v57  ;;  %v155_v63 = vsub.f32 0.0, %v139_v58  ;;  %v126_v0 = vsub.f32 %v83_v60, %v341_v23 }
  0x9e   :  { %245 = vpow2.f32 %v173_v59  ;;  %v125_v1 = vsub.f32 %v79_v61, %v341_v23 }
  0x9f   :  { %v236_v2 = vpop.eup %235  ;;  %v179_v3 = vmul.f32 1.442695, %v156_v62  ;;  %v177_v4 = vmul.f32 1.442695, %v155_v63  ;;  %v142_v5 = vmul.f32 %v126_v0, %v126_v0 }
  0xa0   :  { %v238_v6 = vpop.eup %237  ;;  %200 = vst.msk [vmem:[#allocation5 + $0x10] sm:$0xff] %vm197_vm0, %v236_v2  ;;  %v141_v7 = vmul.f32 %v125_v1, %v125_v1  ;;  %v94_v8 = vpop.permute.xlu1 %93 }
  0xa1   :  { %v90_v9 = vpop.permute.xlu0 %89  ;;  %198 = vst.msk [vmem:[#allocation5] sm:$0xff] %vm197_vm0, %v238_v6  ;;  %247 = vpow2.f32 %v179_v3  ;;  %v158_v10 = vsub.f32 0.0, %v142_v5  ;;  %v128_v11 = vsub.f32 %v94_v8, %v341_v23 }
  0xa2   :  { %v127_v12 = vsub.f32 %v90_v9, %v341_v23  ;;  %249 = vpow2.f32 %v177_v4  ;;  %v157_v13 = vsub.f32 0.0, %v141_v7 }
  0xa3   :  { %v240_v14 = vpop.eup %239  ;;  %v183_v15 = vmul.f32 1.442695, %v158_v10  ;;  %v144_v16 = vmul.f32 %v128_v11, %v128_v11 }
  0xa4   :  { %v143_v17 = vmul.f32 %v127_v12, %v127_v12  ;;  %v242_v18 = vpop.eup %241  ;;  %201 = vst.msk [vmem:[#allocation5 + $0x18] sm:$0xff] %vm197_vm0, %v240_v14  ;;  %v181_v19 = vmul.f32 1.442695, %v157_v13  ;;  %v105_v20 = vpop.permute.xlu1 %104 }
  0xa5   :  { %v101_v21 = vpop.permute.xlu0 %100  ;;  %199 = vst.msk [vmem:[#allocation5 + $0x8] sm:$0xff] %vm197_vm0, %v242_v18  ;;  %251 = vpow2.f32 %v183_v15  ;;  %v160_v22 = vsub.f32 0.0, %v144_v16  ;;  %v130_v25 = vsub.f32 %v105_v20, %v341_v23 }
  0xa6   :  { %v159_v24 = vsub.f32 0.0, %v143_v17  ;;  %253 = vpow2.f32 %v181_v19  ;;  %v129_v26 = vsub.f32 %v101_v21, %v341_v23 }
  0xa7   :  { %v244_v27 = vpop.eup %243  ;;  %v187_v28 = vmul.f32 1.442695, %v160_v22  ;;  %v146_v30 = vmul.f32 %v130_v25, %v130_v25 }
  0xa8   :  { %v185_v29 = vmul.f32 1.442695, %v159_v24  ;;  %v246_v31 = vpop.eup %245  ;;  %203 = vst.msk [vmem:[#allocation5 + $0x28] sm:$0xff] %vm197_vm0, %v244_v27  ;;  %v145_v32 = vmul.f32 %v129_v26, %v129_v26  ;;  %v116_v33 = vpop.permute.xlu1 %115 }
  0xa9   :  { %v112_v34 = vpop.permute.xlu0 %111  ;;  %202 = vst.msk [vmem:[#allocation5 + $0x20] sm:$0xff] %vm197_vm0, %v246_v31  ;;  %255 = vpow2.f32 %v187_v28  ;;  %v162_v35 = vsub.f32 0.0, %v146_v30  ;;  %v132_v36 = vsub.f32 %v116_v33, %v341_v23 }
  0xaa   :  { %v131_v37 = vsub.f32 %v112_v34, %v341_v23  ;;  %257 = vpow2.f32 %v185_v29  ;;  %v161_v38 = vsub.f32 0.0, %v145_v32 }
  0xab   :  { %v248_v39 = vpop.eup %247  ;;  %v191_v40 = vmul.f32 1.442695, %v162_v35  ;;  %v148_v41 = vmul.f32 %v132_v36, %v132_v36 }
  0xac   :  { %v147_v42 = vmul.f32 %v131_v37, %v131_v37  ;;  %v250_v43 = vpop.eup %249  ;;  %205 = vst.msk [vmem:[#allocation5 + $0x38] sm:$0xff] %vm197_vm0, %v248_v39  ;;  %v189_v44 = vmul.f32 1.442695, %v161_v38 }
  0xad   :  { %204 = vst.msk [vmem:[#allocation5 + $0x30] sm:$0xff] %vm197_vm0, %v250_v43  ;;  %259 = vpow2.f32 %v191_v40  ;;  %v164_v45 = vsub.f32 0.0, %v148_v41 }
  0xae   :  { %v163_v46 = vsub.f32 0.0, %v147_v42  ;;  %261 = vpow2.f32 %v189_v44 }
  0xaf   :  { %v252_v47 = vpop.eup %251  ;;  %v195_v48 = vmul.f32 1.442695, %v164_v45 }
  0xb0   :  { %v193_v49 = vmul.f32 1.442695, %v163_v46  ;;  %v254_v23 = vpop.eup %253  ;;  %207 = vst.msk [vmem:[#allocation5 + $0x48] sm:$0xff] %vm197_vm0, %v252_v47 }
  0xb1   :  { %206 = vst.msk [vmem:[#allocation5 + $0x40] sm:$0xff] %vm197_vm0, %v254_v23  ;;  %263 = vpow2.f32 %v195_v48 }
  0xb2   :  { %265 = vpow2.f32 %v193_v49 }
  0xb3   :  { %v256_v50 = vpop.eup %255 }
  0xb4   :  { %v258_v51 = vpop.eup %257  ;;  %209 = vst.msk [vmem:[#allocation5 + $0x58] sm:$0xff] %vm197_vm0, %v256_v50 }
  0xb5   :  { %208 = vst.msk [vmem:[#allocation5 + $0x50] sm:$0xff] %vm197_vm0, %v258_v51 }
  0xb7   :  { %v260_v52 = vpop.eup %259 }
  0xb8   :  { %v262_v53 = vpop.eup %261  ;;  %211 = vst.msk [vmem:[#allocation5 + $0x68] sm:$0xff] %vm197_vm0, %v260_v52 }
  0xb9   :  { %210 = vst.msk [vmem:[#allocation5 + $0x60] sm:$0xff] %vm197_vm0, %v262_v53 }
  0xbb   :  { %v264_v54 = vpop.eup %263 }
  0xbc   :  { %v266_v55 = vpop.eup %265  ;;  %213 = vst.msk [vmem:[#allocation5 + $0x78] sm:$0xff] %vm197_vm0, %v264_v54 }
  0xbd   :  { %212 = vst.msk [vmem:[#allocation5 + $0x70] sm:$0xff] %vm197_vm0, %v266_v55 }
  0xbe   :  { %300 = shalt.err (!%p297_p12)
}
  0xbf   :  { %s301_s22 = scalar_lea.hbm %s388_s1, 2048 }
  0xc0   :  { %p302_p13 = scmp.ne.s32.totalorder %s388_s1, %s301_s22  ;;  %p305_p0 = scmp.lt.u32.totalorder %s301_s22, %s388_s1 }
  0xc2   :  { %p307_p1 = pnand %p305_p0, %p302_p13 }
  0xc4   :  { %310 = shalt.err (!%p307_p1)
}
  0xc5   :  { %s317_s27 = smov 128   ;;  %s318_s28 = smov 8  }
  0xc6   :  { %225 = dma.vmem_to_hbm [thread:$0]  %s220_s18, 2048, %s388_s1, [#allocation4], %s317_s27, %s317_s27, %s318_s28  }
  0xc7   :  { %313 = dma.done.wait [#allocation4], 2048  }
  0xc8   :  { %314 = vsyncadd [#allocation4], 4294965248 }
  0xc9   :  { %229 = vsyncpa [#allocation3], 1 }
  0xca   :  { %230 = vsyncpa [#allocation4], 1 }

</bundles_post_ra>
